<compile_context>
chip_gen: v7x
topology: tpu7x:2x2x1
jax: 0.10.0
libtpu: 0.0.40
codegen_flags: <defaults>
</compile_context>

<pallas_src>
import jax
import jax.numpy as jnp
from jax.experimental import pallas as pl
from jax.experimental.pallas import tpu as pltpu


def _round_up(n, m):
    return ((n + m - 1) // m) * m


def _mlp_kernel(x_ref, w1_ref, b1_ref, w2_ref, b2_ref, o_ref):
    # fc1: (TB, In)bf16 @ (In, H)bf16 -> f32 acc, + b1 (f32), ReLU (f32 VPU).
    x_bf = x_ref[...].astype(jnp.bfloat16)
    h = jnp.dot(x_bf, w1_ref[...], preferred_element_type=jnp.float32)
    h = jnp.maximum(h + b1_ref[...], 0.0)
    # fc2: (TB, H)bf16 @ (H, Cp)bf16 -> f32 acc, + b2 (f32).
    out = jnp.dot(h.astype(jnp.bfloat16), w2_ref[...],
                  preferred_element_type=jnp.float32)
    o_ref[...] = (out + b2_ref[...]).astype(o_ref.dtype)


def prepare_simple_nn_params(w1_t, b1, w2_t, b2, *, param_dtype=jnp.bfloat16):
    """One-time parameter prep (call at init, NOT per forward).

    w1_t: (In, H), b1: (H,), w2_t: (H, C), b2: (C,)  -- all f32.
    Casts weights to bf16 (halves weight DMA, native MXU dtype) and zero-pads
    the class dim of w2/b2 up to a multiple of 128 so the kernel's output
    stores are lane-dense (unmasked vst).
    """
    In, H = w1_t.shape
    H2, C = w2_t.shape
    assert H == H2
    C_pad = _round_up(max(C, 128), 128)
    w2_p = jnp.pad(w2_t, ((0, 0), (0, C_pad - C))) if C_pad != C else w2_t
    b2_p = jnp.pad(b2, ((0, C_pad - C),)) if C_pad != C else b2
    return {
        "w1": w1_t.astype(param_dtype),          # (In, H)
        "b1": b1.reshape(1, H).astype(jnp.float32),
        "w2": w2_p.astype(param_dtype),          # (H, C_pad)
        "b2": b2_p.reshape(1, C_pad).astype(jnp.float32),
        "num_classes": C,
    }


def simple_nn_forward(x, params, *, block_b=512, out_dtype=jnp.float32):
    """x: (B, In) f32; params: output of prepare_simple_nn_params."""
    B, In = x.shape
    w1, b1_row, w2, b2_row = params["w1"], params["b1"], params["w2"], params["b2"]
    C = params["num_classes"]
    H = w1.shape[1]
    C_pad = w2.shape[1]
    assert w1.shape[0] == In

    # Batch tile selection:
    #  - B <= block_b: single full-extent tile (block == full dim, no padding,
    #    no (8,128) constraint issue).
    #  - B  > block_b: tile is a multiple of 8 sublanes, capped so the
    #    "parallel" batch axis has >= 2 grid steps (both v7x TensorCores work).
    if B <= block_b:
        TB = B
    else:
        TB = min(block_b, max(8, _round_up(pl.cdiv(B, 2), 8)))
    grid = (pl.cdiv(B, TB),)

    cost = pl.CostEstimate(
        flops=2 * grid[0] * TB * (In * H + H * C_pad),
        transcendentals=0,
        bytes_accessed=(B * In * 4 + w1.size * 2 + w2.size * 2
                        + b1_row.size * 4 + b2_row.size * 4
                        + B * C_pad * jnp.dtype(out_dtype).itemsize),
    )

    out = pl.pallas_call(
        _mlp_kernel,
        out_shape=jax.ShapeDtypeStruct((B, C_pad), out_dtype),
        grid_spec=pltpu.PrefetchScalarGridSpec(
            num_scalar_prefetch=0,
            grid=grid,
            in_specs=[
                pl.BlockSpec((TB, In), lambda i: (i, 0)),     # x: tiled over batch
                pl.BlockSpec((In, H), lambda i: (0, 0)),      # w1: resident
                pl.BlockSpec((1, H), lambda i: (0, 0)),       # b1: resident
                pl.BlockSpec((H, C_pad), lambda i: (0, 0)),   # w2: resident
                pl.BlockSpec((1, C_pad), lambda i: (0, 0)),   # b2: resident
            ],
            out_specs=pl.BlockSpec((TB, C_pad), lambda i: (i, 0)),
        ),
        compiler_params=pltpu.CompilerParams(
            dimension_semantics=("parallel",)),
        cost_estimate=cost,
    )(x, w1, b1_row, w2, b2_row)

    # Strip the zero class-padding columns (batch is never padded).
    return out[:, :C] if C_pad != C else out


if __name__ == "__main__":
    # Small shapes consistent with the module:
    #   input_size = 32, hiddenSize = 1024 (module default), num_classes = 16
    batch = 8
    input_size = 32
    hidden_size = 1024
    num_classes = 16

    key = jax.random.PRNGKey(0)
    kx, kw1, kb1, kw2, kb2 = jax.random.split(key, 5)

    x = jax.random.normal(kx, (batch, input_size), dtype=jnp.float32)

    # Deterministic parameter init (PyTorch Linear-style uniform bounds).
    bound1 = 1.0 / (input_size ** 0.5)
    w1_t = jax.random.uniform(kw1, (input_size, hidden_size),
                              minval=-bound1, maxval=bound1, dtype=jnp.float32)
    b1 = jax.random.uniform(kb1, (hidden_size,),
                            minval=-bound1, maxval=bound1, dtype=jnp.float32)

    bound2 = 1.0 / (hidden_size ** 0.5)
    w2_t = jax.random.uniform(kw2, (hidden_size, num_classes),
                              minval=-bound2, maxval=bound2, dtype=jnp.float32)
    b2 = jax.random.uniform(kb2, (num_classes,),
                            minval=-bound2, maxval=bound2, dtype=jnp.float32)

    # One-time param prep (cast + pad) -- hoisted out of the forward path.
    params = prepare_simple_nn_params(w1_t, b1, w2_t, b2)
    params = jax.tree_util.tree_map(
        lambda v: jax.block_until_ready(v) if isinstance(v, jax.Array) else v,
        params)

    out = simple_nn_forward(x, params)
    out = jax.block_until_ready(out)
    assert out.shape == (batch, num_classes)

    # Pure-JAX reference using the same bf16-rounded operands (f32 accumulate).
    x_r = x.astype(jnp.bfloat16).astype(jnp.float32)
    w1_r = w1_t.astype(jnp.bfloat16).astype(jnp.float32)
    w2_r = w2_t.astype(jnp.bfloat16).astype(jnp.float32)
    h_r = jnp.maximum(x_r @ w1_r + b1, 0.0)
    h_r = h_r.astype(jnp.bfloat16).astype(jnp.float32)
    ref = h_r @ w2_r + b2
    assert jnp.allclose(out, ref, atol=2e-2, rtol=2e-2), float(
        jnp.max(jnp.abs(out - ref)))

    print("KERNEL_OK")
</pallas_src>

<mosaic_0001>
module attributes {stable_mosaic.version = 11 : i64} {
  func.func @_mlp_kernel(%arg0: i32, %arg1: memref<8x32xf32, #tpu.memory_space<vmem>>, %arg2: memref<32x1024xbf16, #tpu.memory_space<vmem>>, %arg3: memref<1x1024xf32, #tpu.memory_space<vmem>>, %arg4: memref<1024x128xbf16, #tpu.memory_space<vmem>>, %arg5: memref<1x128xf32, #tpu.memory_space<vmem>>, %arg6: memref<8x128xf32, #tpu.memory_space<vmem>>) attributes {dimension_semantics = [#tpu.dimension_semantics<parallel>], iteration_bounds = array<i64: 1>, scalar_prefetch = 0 : i64, scratch_operands = 0 : i64, tpu.core_type = #tpu.core_type<tc>, window_params = [{transform_indices = @transform_0, window_bounds = array<i64: 8, 32>}, {pipeline_mode = #tpu.pipeline_mode<synchronous>, transform_indices = @transform_1, window_bounds = array<i64: 32, 1024>}, {pipeline_mode = #tpu.pipeline_mode<synchronous>, transform_indices = @transform_2, window_bounds = array<i64: 1, 1024>}, {pipeline_mode = #tpu.pipeline_mode<synchronous>, transform_indices = @transform_3, window_bounds = array<i64: 1024, 128>}, {pipeline_mode = #tpu.pipeline_mode<synchronous>, transform_indices = @transform_4, window_bounds = array<i64: 1, 128>}, {transform_indices = @transform_5, window_bounds = array<i64: 8, 128>}]} {
    %c0 = arith.constant 0 : index
    %c0_0 = arith.constant 0 : index
    %0 = vector.load %arg1[%c0, %c0_0] : memref<8x32xf32, #tpu.memory_space<vmem>>, vector<8x32xf32>
    %1 = arith.truncf %0 : vector<8x32xf32> to vector<8x32xbf16>
    %c0_1 = arith.constant 0 : index
    %c0_2 = arith.constant 0 : index
    %2 = vector.load %arg2[%c0_1, %c0_2] : memref<32x1024xbf16, #tpu.memory_space<vmem>>, vector<32x1024xbf16>
    %cst = arith.constant dense<0.000000e+00> : vector<8x1024xf32>
    %3 = tpu.matmul %1, %2, %cst {dimension_numbers = #tpu.dot_dimension_numbers<[1], [0], [0], [1], [0, 0, 1, 1], [], []>} : vector<8x32xbf16>, vector<32x1024xbf16>, vector<8x1024xf32> -> vector<8x1024xf32>
    %c0_3 = arith.constant 0 : index
    %c0_4 = arith.constant 0 : index
    %4 = vector.load %arg3[%c0_3, %c0_4] : memref<1x1024xf32, #tpu.memory_space<vmem>>, vector<1x1024xf32>
    %5 = vector.broadcast %4 : vector<1x1024xf32> to vector<8x1024xf32>
    %6 = arith.addf %3, %5 : vector<8x1024xf32>
    %cst_5 = arith.constant 0.000000e+00 : f32
    %7 = vector.broadcast %cst_5 : f32 to vector<8x1024xf32>
    %8 = arith.maximumf %6, %7 : vector<8x1024xf32>
    %9 = arith.truncf %8 : vector<8x1024xf32> to vector<8x1024xbf16>
    %c0_6 = arith.constant 0 : index
    %c0_7 = arith.constant 0 : index
    %10 = vector.load %arg4[%c0_6, %c0_7] : memref<1024x128xbf16, #tpu.memory_space<vmem>>, vector<1024x128xbf16>
    %cst_8 = arith.constant dense<0.000000e+00> : vector<8x128xf32>
    %11 = tpu.matmul %9, %10, %cst_8 {dimension_numbers = #tpu.dot_dimension_numbers<[1], [0], [0], [1], [0, 0, 1, 1], [], []>} : vector<8x1024xbf16>, vector<1024x128xbf16>, vector<8x128xf32> -> vector<8x128xf32>
    %c0_9 = arith.constant 0 : index
    %c0_10 = arith.constant 0 : index
    %12 = vector.load %arg5[%c0_9, %c0_10] : memref<1x128xf32, #tpu.memory_space<vmem>>, vector<1x128xf32>
    %13 = vector.broadcast %12 : vector<1x128xf32> to vector<8x128xf32>
    %14 = arith.addf %11, %13 : vector<8x128xf32>
    %c0_11 = arith.constant 0 : index
    %c0_12 = arith.constant 0 : index
    %15 = vector.load %arg6[%c0_11, %c0_12] : memref<8x128xf32, #tpu.memory_space<vmem>>, vector<8x128xf32>
    tpu.vector_store %arg6[%c0_11, %c0_12], %14 {strides = array<i32>} : memref<8x128xf32, #tpu.memory_space<vmem>>, vector<8x128xf32>,
    return
  }
  func.func @transform_0(%arg0: i32) -> (i32, i32) {
    %c0_i32 = arith.constant 0 : i32
    %c0_i32_0 = arith.constant 0 : i32
    return %arg0, %c0_i32 : i32, i32
  }
  func.func @transform_1(%arg0: i32) -> (i32, i32) {
    %c0_i32 = arith.constant 0 : i32
    %c0_i32_0 = arith.constant 0 : i32
    %c0_i32_1 = arith.constant 0 : i32
    return %c0_i32, %c0_i32_0 : i32, i32
  }
  func.func @transform_2(%arg0: i32) -> (i32, i32) {
    %c0_i32 = arith.constant 0 : i32
    %c0_i32_0 = arith.constant 0 : i32
    %c0_i32_1 = arith.constant 0 : i32
    return %c0_i32, %c0_i32_0 : i32, i32
  }
  func.func @transform_3(%arg0: i32) -> (i32, i32) {
    %c0_i32 = arith.constant 0 : i32
    %c0_i32_0 = arith.constant 0 : i32
    %c0_i32_1 = arith.constant 0 : i32
    return %c0_i32, %c0_i32_0 : i32, i32
  }
  func.func @transform_4(%arg0: i32) -> (i32, i32) {
    %c0_i32 = arith.constant 0 : i32
    %c0_i32_0 = arith.constant 0 : i32
    %c0_i32_1 = arith.constant 0 : i32
    return %c0_i32, %c0_i32_0 : i32, i32
  }
  func.func @transform_5(%arg0: i32) -> (i32, i32) {
    %c0_i32 = arith.constant 0 : i32
    %c0_i32_0 = arith.constant 0 : i32
    return %arg0, %c0_i32 : i32, i32
  }
}

</mosaic_0001>

<bundles_post_ra>
// kernel: tpu_custom_call.1
= control target key start
LH: loop header
LB: loop body
LE: loop exit
PB: predicated region body
PF: predicated region fallthrough
CT: control target
= control target key end

     0   :  { %10 = vsyncpa [#allocation3], 0  ;;  %s1589_s0 = inlined_call_operand.hbm [shape: f32[8,32], index: 0, kind: input, shape index: {}]   ;;  %s1590_s1 = inlined_call_operand.hbm [shape: bf16[32,1024], index: 1, kind: input, shape index: {}]   ;;  %s1591_s2 = inlined_call_operand.hbm [shape: f32[1,1024], index: 2, kind: input, shape index: {}]   ;;  %s1592_s3 = inlined_call_operand.hbm [shape: bf16[1024,128], index: 3, kind: input, shape index: {}]   ;;  %s1593_s4 = inlined_call_operand.vmem [shape: f32[1,128], index: 4, kind: input, shape index: {}]   ;;  %s1594_s5 = inlined_call_operand.hbm [shape: f32[8,128], index: 5, kind: output, shape index: {}]  }
   0x1   :  { %11 = vsyncpa [#allocation6], 0 }
   0x2   :  { %12 = vsyncpa [#allocation9], 0 }
   0x3   :  { %13 = vsyncpa [#allocation4], 0  ;;  %s1459_s18 = smov [#allocation5]   ;;  %s1341_s22 = scalar_lea.hbm %s1590_s1, 2048 }
   0x4   :  { %s29_s19 = sshll.u32 %s1459_s18, 4  ;;  %p1342_p0 = scmp.ne.s32.totalorder %s1590_s1, %s1341_s22  ;;  %s30_s19 = int_to_ptr.vmem [resolvable:$true] %s29_s19 }
   0x5   :  { %p1345_p1 = scmp.lt.u32.totalorder %s1341_s22, %s1590_s1 }
   0x7   :  { %p1347_p2 = pnand %p1345_p1, %p1342_p0 }
   0x9   :  { %1350 = shalt.err (!%p1347_p2)
}
   0xa   :  { %s1351_s27 = scalar_lea.vmem %s30_s19, 2048  ;;  %p1356_p4 = scmp.lt.s32.totalorder %s30_s19, %s30_s19 }
   0xb   :  { %p1352_p3 = scmp.ne.s32.totalorder %s30_s19, %s1351_s27  ;;  %p1357_p5 = scmp.lt.s32.totalorder %s1351_s27, %s1351_s27 }
   0xd   :  { %p1358_p6 = por %p1357_p5, %p1356_p4 }
   0xf   :  { %p1359_p7 = pnand %p1358_p6, %p1352_p3 }
  0x11   :  { %1362 = shalt.err (!%p1359_p7)
}
  0x12   :  { %s1460_s28 = smov 512   ;;  %s1461_s29 = smov 32  }
  0x13   :  { %35 = dma.hbm_to_vmem [thread:$0]  %s1590_s1, 2048, %s30_s19, [#allocation6], %s1460_s28, %s1460_s28, %s1461_s29  }
  0x14   :  { %s1462_s7 = smov [#allocation2]   ;;  %s1463_s9 = smov [#allocation7]  }
  0x15   :  { %s20_s8 = sshll.u32 %s1462_s7, 4  ;;  %s42_s10 = sshll.u32 %s1463_s9, 4  ;;  %s21_s8 = int_to_ptr.vmem [resolvable:$true] %s20_s8  ;;  %s43_s10 = int_to_ptr.vmem [resolvable:$true] %s42_s10 }
  0x16   :  { %s1363_s13 = scalar_lea.hbm %s1589_s0, 128 }
  0x17   :  { %p1364_p8 = scmp.ne.s32.totalorder %s1589_s0, %s1363_s13  ;;  %p1367_p9 = scmp.lt.u32.totalorder %s1363_s13, %s1589_s0 }
  0x19   :  { %p1369_p10 = pnand %p1367_p9, %p1364_p8 }
  0x1b   :  { %1372 = shalt.err (!%p1369_p10)
}
  0x1c   :  { %s1373_s1 = scalar_lea.vmem %s21_s8, 128  ;;  %p1378_p12 = scmp.lt.s32.totalorder %s21_s8, %s21_s8 }
  0x1d   :  { %p1374_p11 = scmp.ne.s32.totalorder %s21_s8, %s1373_s1  ;;  %p1379_p13 = scmp.lt.s32.totalorder %s1373_s1, %s1373_s1 }
  0x1f   :  { %p1380_p0 = por %p1379_p13, %p1378_p12 }
  0x21   :  { %p1381_p1 = pnand %p1380_p0, %p1374_p11 }
  0x23   :  { %1384 = shalt.err (!%p1381_p1)
}
  0x24   :  { %23 = dma.hbm_to_vmem [thread:$0]  %s1589_s0, 128, %s21_s8, [#allocation3]  }
  0x25   :  { %s1385_s22 = scalar_lea.hbm %s1591_s2, 128 }
  0x26   :  { %p1386_p2 = scmp.ne.s32.totalorder %s1591_s2, %s1385_s22  ;;  %p1389_p3 = scmp.lt.u32.totalorder %s1385_s22, %s1591_s2 }
  0x28   :  { %p1391_p4 = pnand %p1389_p3, %p1386_p2 }
  0x2a   :  { %1394 = shalt.err (!%p1391_p4)
}
  0x2b   :  { %s1395_s27 = scalar_lea.vmem %s43_s10, 128  ;;  %p1400_p6 = scmp.lt.s32.totalorder %s43_s10, %s43_s10 }
  0x2c   :  { %p1396_p5 = scmp.ne.s32.totalorder %s43_s10, %s1395_s27  ;;  %p1401_p7 = scmp.lt.s32.totalorder %s1395_s27, %s1395_s27 }
  0x2e   :  { %p1402_p8 = por %p1401_p7, %p1400_p6 }
  0x30   :  { %p1403_p9 = pnand %p1402_p8, %p1396_p5 }
  0x32   :  { %1406 = shalt.err (!%p1403_p9)
}
  0x33   :  { %45 = dma.hbm_to_vmem [thread:$0]  %s1591_s2, 128, %s43_s10, [#allocation6]  }
  0x34   :  { %s1464_s29 = smov [#allocation8]   ;;  %s1407_s8 = scalar_lea.hbm %s1592_s3, 8192 }
  0x35   :  { %s51_s30 = sshll.u32 %s1464_s29, 4  ;;  %p1408_p10 = scmp.ne.s32.totalorder %s1592_s3, %s1407_s8  ;;  %s52_s30 = int_to_ptr.vmem [resolvable:$true] %s51_s30 }
  0x36   :  { %p1411_p11 = scmp.lt.u32.totalorder %s1407_s8, %s1592_s3 }
  0x38   :  { %p1413_p12 = pnand %p1411_p11, %p1408_p10 }
  0x3a   :  { %1416 = shalt.err (!%p1413_p12)
}
  0x3b   :  { %s1417_s14 = scalar_lea.vmem %s52_s30, 8192  ;;  %p1422_p0 = scmp.lt.s32.totalorder %s52_s30, %s52_s30 }
  0x3c   :  { %p1418_p13 = scmp.ne.s32.totalorder %s52_s30, %s1417_s14  ;;  %p1423_p1 = scmp.lt.s32.totalorder %s1417_s14, %s1417_s14 }
  0x3e   :  { %p1424_p2 = por %p1423_p1, %p1422_p0 }
  0x40   :  { %p1425_p3 = pnand %p1424_p2, %p1418_p13 }
  0x42   :  { %1428 = shalt.err (!%p1425_p3)
}
  0x43   :  { %s1465_s2 = smov 64   ;;  %s1466_s10 = smov 4  }
  0x44   :  { %57 = dma.hbm_to_vmem [thread:$0]  %s1592_s3, 8192, %s52_s30, [#allocation9], %s1465_s2, %s1465_s2, %s1466_s10  }
  0x45   :  { %1451 = dma.done.wait [#allocation3], 128  }
  0x46   :  { %1452 = vsyncadd [#allocation3], 4294967168 }
  0x47   :  { %1453 = dma.done.wait [#allocation6], 2176  }
  0x48   :  { %1454 = vsyncadd [#allocation6], 4294965120 }
  0x49   :  { %1455 = dma.done.wait [#allocation9], 8192  }
  0x4a   :  { %1456 = vsyncadd [#allocation9], 4294959104  ;;  %v1467_v0 = vmov 0   ;;  %v75_v1 = vld [vmem:[#allocation5] sm:$0xff]  ;;  %v76_v3 = vld [vmem:[#allocation5 + $0x8] sm:$0xff]  ;;  %vm213_vm0 = vcmask 261120  }
  0x4b   :  { %249 = vmatprep.mubr.bf16.mxu0 %v1467_v0  ;;  %290 = vmatprep.mubr.bf16.mxu1 %v1467_v0  ;;  %v79_v2 = vld [vmem:[#allocation5 + $0x20] sm:$0xff]  ;;  %v80_v5 = vld [vmem:[#allocation5 + $0x28] sm:$0xff]  ;;  %v77_v15 = vld [vmem:[#allocation5 + $0x10] sm:$0xff] }
  0x4c   :  { %v1095_v4 = vcombine.high %v75_v1, %v79_v2  ;;  %v1094_v6 = vcombine.low %v75_v1, %v79_v2  ;;  %v83_v7 = vld [vmem:[#allocation5 + $0x40] sm:$0xff]  ;;  %v1097_v9 = vcombine.high %v76_v3, %v80_v5  ;;  %v1096_v10 = vcombine.low %v76_v3, %v80_v5  ;;  %v84_v12 = vld [vmem:[#allocation5 + $0x48] sm:$0xff]  ;;  %v81_v16 = vld [vmem:[#allocation5 + $0x30] sm:$0xff] }
  0x4d   :  { %v87_v8 = vld [vmem:[#allocation5 + $0x60] sm:$0xff]  ;;  %v88_v13 = vld [vmem:[#allocation5 + $0x68] sm:$0xff]  ;;  %v78_v17 = vld [vmem:[#allocation5 + $0x18] sm:$0xff]  ;;  %v1099_v22 = vcombine.high %v77_v15, %v81_v16  ;;  %v1098_v29 = vcombine.low %v77_v15, %v81_v16  ;;  %v93_v5 = vlaneseq }
  0x4e   :  { %v1103_v11 = vcombine.high %v83_v7, %v87_v8  ;;  %217 = vmatprep.subr.bf16.mxu0 %v1095_v4  ;;  %v1105_v14 = vcombine.high %v84_v12, %v88_v13  ;;  %258 = vmatprep.subr.bf16.mxu1 %v1097_v9  ;;  %v1102_v18 = vcombine.low %v83_v7, %v87_v8  ;;  %v73_v19 = vld [vmem:[#allocation2] sm:$0xff]  ;;  %v85_v23 = vld [vmem:[#allocation5 + $0x50] sm:$0xff]  ;;  %v1277_v35 = vld [vmem:[#allocation8 + $0x40] sm:$0xff]  }
  0x4f   :  { %218 = vmatpush1.bf16.msra.mxu0 %v1094_v6  ;;  %v82_v20 = vld [vmem:[#allocation5 + $0x38] sm:$0xff]  ;;  %259 = vmatpush1.bf16.msra.mxu1 %v1096_v10  ;;  %v1104_v21 = vcombine.low %v84_v12, %v88_v13  ;;  %v89_v24 = vld [vmem:[#allocation5 + $0x70] sm:$0xff]  ;;  %v74_v27 = vpack.c.bf16 %v73_v19, %v73_v19  ;;  %v1278_v36 = vld [vmem:[#allocation8 + $0xc0] sm:$0xff]   ;;  %v1551_v6 = vshrl.u32 %v93_v5, 7 }
  0x50   :  { %219 = vmatprep.subr.bf16.mxu0 %v1103_v11  ;;  %260 = vmatprep.subr.bf16.mxu1 %v1105_v14  ;;  %v1101_v25 = vcombine.high %v78_v17, %v82_v20  ;;  %v86_v26 = vld [vmem:[#allocation5 + $0x58] sm:$0xff]  ;;  %v1100_v30 = vcombine.low %v78_v17, %v82_v20  ;;  %v1107_v31 = vcombine.high %v85_v23, %v89_v24  ;;  %v1279_v37 = vld [vmem:[#allocation8] sm:$0xff]   ;;  %v1281_v39 = vld [vmem:[#allocation8 + $0x48] sm:$0xff]  }
  0x51   :  { %v90_v28 = vld [vmem:[#allocation5 + $0x78] sm:$0xff]  ;;  %v1106_v33 = vcombine.low %v85_v23, %v89_v24  ;;  %v1280_v38 = vld [vmem:[#allocation8 + $0x80] sm:$0xff]   ;;  %v1282_v40 = vld [vmem:[#allocation8 + $0xc8] sm:$0xff]   ;;  %v95_v7 = vsub.s32 0, %v1551_v6  ;;  %v103_v9 = vsub.s32 2, %v1551_v6  ;;  %v99_v10 = vsub.s32 1, %v1551_v6 }
  0x52   :  { %v1109_v32 = vcombine.high %v86_v26, %v90_v28  ;;  %v1108_v34 = vcombine.low %v86_v26, %v90_v28  ;;  %v1283_v41 = vld [vmem:[#allocation8 + $0x8] sm:$0xff]   ;;  %v1285_v43 = vld [vmem:[#allocation8 + $0x50] sm:$0xff]   ;;  %v1289_v47 = vld [vmem:[#allocation8 + $0x58] sm:$0xff]   ;;  %v107_v11 = vsub.s32 3, %v1551_v6  ;;  %v115_v24 = vsub.s32 5, %v1551_v6 }
  0x53   :  { %220 = vmatpush1.bf16.msra.mxu0 %v1102_v18  ;;  %261 = vmatpush1.bf16.msra.mxu1 %v1104_v21  ;;  %v1284_v42 = vld [vmem:[#allocation8 + $0x88] sm:$0xff]   ;;  %v1286_v44 = vld [vmem:[#allocation8 + $0xd0] sm:$0xff]   ;;  %v1290_v48 = vld [vmem:[#allocation8 + $0xd8] sm:$0xff]  }
  0x54   :  { %299 = vmatprep.subr.bf16.mxu0 %v1099_v22  ;;  %340 = vmatprep.subr.bf16.mxu1 %v1101_v25  ;;  %v1287_v45 = vld [vmem:[#allocation8 + $0x10] sm:$0xff]   ;;  %v1291_v49 = vld [vmem:[#allocation8 + $0x18] sm:$0xff]   ;;  %v1293_v51 = vld [vmem:[#allocation8 + $0x60] sm:$0xff]  }
  0x55   :  { %v1288_v46 = vld [vmem:[#allocation8 + $0x90] sm:$0xff]   ;;  %v1292_v50 = vld [vmem:[#allocation8 + $0x98] sm:$0xff]   ;;  %v1294_v52 = vld [vmem:[#allocation8 + $0xe0] sm:$0xff]  }
  0x56   :  { %1110 = vmatmul.mubr.msk.bf16.vlgmr.msra.gmra.mrb[0].mxu0 %vm213_vm0, %v74_v27  ;;  %1111 = vmatmul.mubr.msk.bf16.vlgmr.msra.gmra.mrb[0].mxu1 %vm213_vm0, %v74_v27  ;;  %v1295_v53 = vld [vmem:[#allocation8 + $0x20] sm:$0xff]   ;;  %v1297_v55 = vld [vmem:[#allocation8 + $0x68] sm:$0xff]   ;;  %v1301_v59 = vld [vmem:[#allocation8 + $0x70] sm:$0xff]  }
  0x57   :  { %300 = vmatpush1.bf16.msra.mxu0 %v1098_v29  ;;  %341 = vmatpush1.bf16.msra.mxu1 %v1100_v30  ;;  %v1296_v54 = vld [vmem:[#allocation8 + $0xa0] sm:$0xff]   ;;  %v1298_v56 = vld [vmem:[#allocation8 + $0xe8] sm:$0xff]   ;;  %v1302_v60 = vld [vmem:[#allocation8 + $0xf0] sm:$0xff]   ;;  %v123_v29 = vsub.s32 7, %v1551_v6 }
  0x58   :  { %301 = vmatprep.subr.bf16.mxu0 %v1107_v31  ;;  %342 = vmatprep.subr.bf16.mxu1 %v1109_v32  ;;  %v1299_v57 = vld [vmem:[#allocation8 + $0x28] sm:$0xff]   ;;  %v1303_v61 = vld [vmem:[#allocation8 + $0x30] sm:$0xff]   ;;  %v1305_v63 = vld [vmem:[#allocation8 + $0x78] sm:$0xff]  }
  0x59   :  { %331 = vmatprep.mubr.bf16.mxu0 %v1467_v0  ;;  %372 = vmatprep.mubr.bf16.mxu1 %v1467_v0  ;;  %v1300_v58 = vld [vmem:[#allocation8 + $0xa8] sm:$0xff]   ;;  %v1304_v62 = vld [vmem:[#allocation8 + $0xb0] sm:$0xff]   ;;  %v1306_v0 = vld [vmem:[#allocation8 + $0xf8] sm:$0xff]  }
  0x5a   :  { %v1307_v1 = vld [vmem:[#allocation8 + $0x38] sm:$0xff]   ;;  %v1309_v3 = vld [vmem:[#allocation8 + $0x140] sm:$0xff]  }
  0x5b   :  { %302 = vmatpush1.bf16.msra.mxu0 %v1106_v33  ;;  %343 = vmatpush1.bf16.msra.mxu1 %v1108_v34  ;;  %v1308_v2 = vld [vmem:[#allocation8 + $0xb8] sm:$0xff]   ;;  %v1310_v4 = vld [vmem:[#allocation8 + $0x1c0] sm:$0xff]  }
  0x5c   :  { %1179 = vmatprep.subr.bf16.mxu0 %v1277_v35  ;;  %1201 = vmatprep.subr.bf16.mxu1 %v1278_v36  ;;  %v1554_v8 = vld [vmem:[#allocation7] sm:$0xff]  ;;  %v1311_v36 = vld [vmem:[#allocation8 + $0x100] sm:$0xff]  }
  0x5d   :  { %v96_v12 = vrot.slane %v1554_v8, %v95_v7  ;;  %v104_v13 = vrot.slane %v1554_v8, %v103_v9  ;;  %v100_v14 = vrot.slane %v1554_v8, %v99_v10  ;;  %v108_v15 = vrot.slane %v1554_v8, %v107_v11  ;;  %v1326_v5 = vld [vmem:[#allocation8 + $0x1e0] sm:$0xff]  }
  0x5e   :  { %1112 = vmatmul.mubr.msk.bf16.vlgmr.msra.gmra.mrb[4].mxu0 %vm213_vm0, %v74_v27  ;;  %1113 = vmatmul.mubr.msk.bf16.vlgmr.msra.gmra.mrb[4].mxu1 %vm213_vm0, %v74_v27  ;;  %v1327_v7 = vld [vmem:[#allocation8 + $0x120] sm:$0xff]   ;;  %v119_v9 = vsub.s32 6, %v1551_v6  ;;  %v111_v11 = vsub.s32 4, %v1551_v6 }
  0x5f   :  { %1180 = vmatpush3.bf16.msra.mxu0 %v1279_v37  ;;  %1202 = vmatpush3.bf16.msra.mxu1 %v1280_v38  ;;  %v116_v37 = vrot.slane %v1554_v8, %v115_v24  ;;  %v1328_v10 = vld [vmem:[#allocation8 + $0x1a0] sm:$0xff]   ;;  %v1338_v24 = vld [vmem:[#allocation8 + $0x1f8] sm:$0xff]  }
  0x60   :  { %1181 = vmatprep.subr.bf16.mxu0 %v1281_v39  ;;  %1203 = vmatprep.subr.bf16.mxu1 %v1282_v40  ;;  %v1312_v40 = vld [vmem:[#allocation8 + $0x180] sm:$0xff]  }
  0x63   :  { %1182 = vmatpush3.bf16.msra.mxu0 %v1283_v41  ;;  %1204 = vmatpush3.bf16.msra.mxu1 %v1284_v42  ;;  %v1313_v41 = vld [vmem:[#allocation8 + $0x148] sm:$0xff]   ;;  %v124_v42 = vrot.slane %v1554_v8, %v123_v29 }
  0x64   :  { %1183 = vmatprep.subr.bf16.mxu0 %v1285_v43  ;;  %1205 = vmatprep.subr.bf16.mxu1 %v1286_v44  ;;  %v1314_v43 = vld [vmem:[#allocation8 + $0x1c8] sm:$0xff]  }
  0x67   :  { %1184 = vmatpush3.bf16.msra.mxu0 %v1287_v45  ;;  %1206 = vmatpush3.bf16.msra.mxu1 %v1288_v46 }
  0x68   :  { %1185 = vmatprep.subr.bf16.mxu0 %v1289_v47  ;;  %1207 = vmatprep.subr.bf16.mxu1 %v1290_v48  ;;  %v1315_v47 = vld [vmem:[#allocation8 + $0x108] sm:$0xff]  }
  0x6b   :  { %1186 = vmatpush3.bf16.msra.mxu0 %v1291_v49  ;;  %1208 = vmatpush3.bf16.msra.mxu1 %v1292_v50 }
  0x6c   :  { %1187 = vmatprep.subr.bf16.mxu0 %v1293_v51  ;;  %1209 = vmatprep.subr.bf16.mxu1 %v1294_v52  ;;  %v1316_v51 = vld [vmem:[#allocation8 + $0x188] sm:$0xff]   ;;  %v1317_v52 = vld [vmem:[#allocation8 + $0x150] sm:$0xff]  }
  0x6f   :  { %1188 = vmatpush3.bf16.msra.mxu0 %v1295_v53  ;;  %1210 = vmatpush3.bf16.msra.mxu1 %v1296_v54 }
  0x70   :  { %1189 = vmatprep.subr.bf16.mxu0 %v1297_v55  ;;  %1211 = vmatprep.subr.bf16.mxu1 %v1298_v56  ;;  %v1318_v56 = vld [vmem:[#allocation8 + $0x1d0] sm:$0xff]  }
  0x73   :  { %1190 = vmatpush3.bf16.msra.mxu0 %v1299_v57  ;;  %1212 = vmatpush3.bf16.msra.mxu1 %v1300_v58 }
  0x74   :  { %1191 = vmatprep.subr.bf16.mxu0 %v1301_v59  ;;  %1213 = vmatprep.subr.bf16.mxu1 %v1302_v60  ;;  %v1319_v60 = vld [vmem:[#allocation8 + $0x110] sm:$0xff]  }
  0x77   :  { %1192 = vmatpush3.bf16.msra.mxu0 %v1303_v61  ;;  %1214 = vmatpush3.bf16.msra.mxu1 %v1304_v62  ;;  %v1320_v62 = vld [vmem:[#allocation8 + $0x190] sm:$0xff]  }
  0x78   :  { %1193 = vmatprep.subr.bf16.mxu0 %v1305_v63  ;;  %1215 = vmatprep.subr.bf16.mxu1 %v1306_v0  ;;  %v1321_v63 = vld [vmem:[#allocation8 + $0x158] sm:$0xff]  }
  0x7b   :  { %1194 = vmatpush3.bf16.msra.mxu0 %v1307_v1  ;;  %1216 = vmatpush3.bf16.msra.mxu1 %v1308_v2  ;;  %v1322_v1 = vld [vmem:[#allocation8 + $0x1d8] sm:$0xff]  }
  0x7c   :  { %1223 = vmatprep.subr.bf16.mxu0 %v1309_v3  ;;  %1245 = vmatprep.subr.bf16.mxu1 %v1310_v4  ;;  %v1323_v2 = vld [vmem:[#allocation8 + $0x118] sm:$0xff]   ;;  %v1325_v4 = vld [vmem:[#allocation8 + $0x160] sm:$0xff]  }
  0x7d   :  { %v1324_v3 = vld [vmem:[#allocation8 + $0x198] sm:$0xff]  }
 0x129   :  { %v251_v16 = vpop.f32.mrb[0].mxu0  ;;  %v292_v18 = vpop.f32.mrb[0].mxu1 }
 0x12a   :  { %v252_v17 = vadd.f32 %v251_v16, %v96_v12  ;;  %v253_v19 = vpop.f32.mrb[1].mxu0  ;;  %v293_v20 = vadd.f32 %v292_v18, %v104_v13  ;;  %v294_v22 = vpop.f32.mrb[1].mxu1  ;;  %v1329_v12 = vld [vmem:[#allocation8 + $0x168] sm:$0xff]   ;;  %v112_v16 = vrot.slane %v1554_v8, %v111_v11  ;;  %v1333_v18 = vld [vmem:[#allocation8 + $0x170] sm:$0xff]  }
 0x12b   :  { %v254_v21 = vadd.f32 %v253_v19, %v100_v14  ;;  %v255_v23 = vpop.f32.mrb[2].mxu0  ;;  %v295_v26 = vadd.f32 %v294_v22, %v108_v15  ;;  %v296_v27 = vpop.f32.mrb[2].mxu1  ;;  %v1330_v13 = vld [vmem:[#allocation8 + $0x1e8] sm:$0xff]   ;;  %v120_v15 = vrot.slane %v1554_v8, %v119_v9  ;;  %v1334_v19 = vld [vmem:[#allocation8 + $0x1f0] sm:$0xff]  }
 0x12c   :  { %v381_v25 = vmax.f32 %v252_v17, 0.0  ;;  %v256_v28 = vpop.f32.mrb[3].mxu0  ;;  %v383_v30 = vmax.f32 %v293_v20, 0.0  ;;  %v297_v32 = vpop.f32.mrb[3].mxu1  ;;  %v1331_v14 = vld [vmem:[#allocation8 + $0x128] sm:$0xff]   ;;  %v1336_v22 = vld [vmem:[#allocation8 + $0x1b0] sm:$0xff]  }
 0x12d   :  { %v382_v31 = vmax.f32 %v254_v21, 0.0  ;;  %v384_v33 = vmax.f32 %v295_v26, 0.0  ;;  %v1332_v17 = vld [vmem:[#allocation8 + $0x1a8] sm:$0xff]   ;;  %v1335_v21 = vld [vmem:[#allocation8 + $0x130] sm:$0xff]   ;;  %v1337_v23 = vld [vmem:[#allocation8 + $0x178] sm:$0xff]  }
 0x12e   :  { %v391_v34 = vpack.c.bf16 %v383_v30, %v383_v30  ;;  %v389_v38 = vpack.c.bf16 %v381_v25, %v381_v25  ;;  %v1339_v26 = vld [vmem:[#allocation8 + $0x138] sm:$0xff]   ;;  %v1114_v32 = vld [vmem:[%s1593_s4] ss:$0 sm:$0xff]  ;;  %s1468_s4 = smov [#allocation10]  }
 0x12f   :  { %v390_v35 = vpack.c.bf16 %v382_v31, %v382_v31  ;;  %v392_v39 = vpack.c.bf16 %v384_v33, %v384_v33  ;;  %v1340_v27 = vld [vmem:[#allocation8 + $0x1b8] sm:$0xff]   ;;  %s1083_s1 = sshll.u32 %s1468_s4, 4  ;;  %s1084_s1 = int_to_ptr.vmem [resolvable:$true] %s1083_s1 }
 0x130   :  { %s1429_s18 = scalar_lea.vmem %s1084_s1, 128  ;;  %p1434_p5 = scmp.lt.s32.totalorder %s1084_s1, %s1084_s1 }
 0x131   :  { %948 = vmatprep.mubr.bf16.mxu0 %v390_v35  ;;  %v1567_v44 = vpop.f32.mrb[4].mxu0  ;;  %988 = vmatprep.mubr.bf16.mxu1 %v392_v39  ;;  %v374_v46 = vpop.f32.mrb[4].mxu1  ;;  %p1430_p4 = scmp.ne.s32.totalorder %s1084_s1, %s1429_s18  ;;  %p1435_p6 = scmp.lt.s32.totalorder %s1429_s18, %s1429_s18 }
 0x132   :  { %949 = vmatmul.mubr.bf16.vlgmr.msra.gmra.mrb[8].mxu0 %v389_v38  ;;  %v335_v45 = vpop.f32.mrb[5].mxu0  ;;  %989 = vmatmul.mubr.bf16.vlgmr.msra.gmra.mrb[8].mxu1 %v391_v34  ;;  %v376_v50 = vpop.f32.mrb[5].mxu1  ;;  %v375_v20 = vadd.f32 %v374_v46, %v120_v15  ;;  %v334_v6 = vadd.f32 %v1567_v44, %v112_v16 }
 0x133   :  { %1224 = vmatpush3.bf16.msra.mxu0 %v1311_v36  ;;  %v336_v48 = vadd.f32 %v335_v45, %v116_v37  ;;  %v337_v49 = vpop.f32.mrb[6].mxu0  ;;  %1246 = vmatpush3.bf16.msra.mxu1 %v1312_v40  ;;  %v377_v54 = vadd.f32 %v376_v50, %v124_v42  ;;  %v378_v55 = vpop.f32.mrb[6].mxu1  ;;  %p1436_p7 = por %p1435_p6, %p1434_p5 }
 0x134   :  { %1225 = vmatprep.subr.bf16.mxu0 %v1313_v41  ;;  %v338_v53 = vpop.f32.mrb[7].mxu0  ;;  %1247 = vmatprep.subr.bf16.mxu1 %v1314_v43  ;;  %v379_v58 = vpop.f32.mrb[7].mxu1  ;;  %v387_v25 = vmax.f32 %v375_v20, 0.0  ;;  %v385_v8 = vmax.f32 %v334_v6, 0.0 }
 0x135   :  { %v386_v57 = vmax.f32 %v336_v48, 0.0  ;;  %v388_v59 = vmax.f32 %v377_v54, 0.0  ;;  %p1437_p8 = pnand %p1436_p7, %p1430_p4 }
 0x136   :  { %v395_v28 = vpack.c.bf16 %v387_v25, %v387_v25  ;;  %v393_v29 = vpack.c.bf16 %v385_v8, %v385_v8 }
 0x137   :  { %1226 = vmatpush3.bf16.msra.mxu0 %v1315_v47  ;;  %v394_v61 = vpack.c.bf16 %v386_v57, %v386_v57  ;;  %1248 = vmatpush3.bf16.msra.mxu1 %v1316_v51  ;;  %v396_v0 = vpack.c.bf16 %v388_v59, %v388_v59 }
 0x138   :  { %1227 = vmatprep.subr.bf16.mxu0 %v1317_v52  ;;  %1249 = vmatprep.subr.bf16.mxu1 %v1318_v56 }
 0x139   :  { %1028 = vmatprep.mubr.bf16.mxu0 %v394_v61  ;;  %1068 = vmatprep.mubr.bf16.mxu1 %v396_v0 }
 0x13b   :  { %1228 = vmatpush3.bf16.msra.mxu0 %v1319_v60  ;;  %1250 = vmatpush3.bf16.msra.mxu1 %v1320_v62 }
 0x13c   :  { %1229 = vmatprep.subr.bf16.mxu0 %v1321_v63  ;;  %1251 = vmatprep.subr.bf16.mxu1 %v1322_v1 }
 0x13f   :  { %1230 = vmatpush3.bf16.msra.mxu0 %v1323_v2  ;;  %1252 = vmatpush3.bf16.msra.mxu1 %v1324_v3 }
 0x140   :  { %1231 = vmatprep.subr.bf16.mxu0 %v1325_v4  ;;  %1253 = vmatprep.subr.bf16.mxu1 %v1326_v5 }
 0x143   :  { %1232 = vmatpush3.bf16.msra.mxu0 %v1327_v7  ;;  %1254 = vmatpush3.bf16.msra.mxu1 %v1328_v10 }
 0x144   :  { %1233 = vmatprep.subr.bf16.mxu0 %v1329_v12  ;;  %1255 = vmatprep.subr.bf16.mxu1 %v1330_v13 }
 0x147   :  { %1234 = vmatpush3.bf16.msra.mxu0 %v1331_v14  ;;  %1256 = vmatpush3.bf16.msra.mxu1 %v1332_v17 }
 0x148   :  { %1235 = vmatprep.subr.bf16.mxu0 %v1333_v18  ;;  %1257 = vmatprep.subr.bf16.mxu1 %v1334_v19 }
 0x14b   :  { %1236 = vmatpush3.bf16.msra.mxu0 %v1335_v21  ;;  %1258 = vmatpush3.bf16.msra.mxu1 %v1336_v22 }
 0x14c   :  { %1237 = vmatprep.subr.bf16.mxu0 %v1337_v23  ;;  %1259 = vmatprep.subr.bf16.mxu1 %v1338_v24 }
 0x14f   :  { %1238 = vmatpush3.bf16.msra.mxu0 %v1339_v26  ;;  %1260 = vmatpush3.bf16.msra.mxu1 %v1340_v27 }
 0x152   :  { %1029 = vmatmul.mubr.bf16.vlgmr.msra.gmra.mrb[12].mxu0 %v393_v29  ;;  %1069 = vmatmul.mubr.bf16.vlgmr.msra.gmra.mrb[12].mxu1 %v395_v28 }
 0x205   :  { %v1195_v30 = vpop.f32.mrb[8].mxu0  ;;  %v1217_v31 = vpop.f32.mrb[8].mxu1 }
 0x206   :  { %v1196_v33 = vpop.f32.mrb[9].mxu0  ;;  %v1218_v35 = vpop.f32.mrb[9].mxu1 }
 0x207   :  { %v1197_v34 = vadd.f32 %v1196_v33, %v1195_v30  ;;  %v1198_v36 = vpop.f32.mrb[10].mxu0  ;;  %v1219_v37 = vadd.f32 %v1218_v35, %v1217_v31  ;;  %v1220_v38 = vpop.f32.mrb[10].mxu1 }
 0x208   :  { %v1199_v39 = vpop.f32.mrb[11].mxu0  ;;  %v1221_v41 = vpop.f32.mrb[11].mxu1 }
 0x209   :  { %v951_v40 = vadd.f32 %v1197_v34, %v1114_v32 }
 0x20b   :  { %v991_v42 = vadd.f32 %v1219_v37, %v951_v40 }
 0x225   :  { %v1239_v43 = vpop.f32.mrb[12].mxu0  ;;  %v1261_v44 = vpop.f32.mrb[12].mxu1 }
 0x226   :  { %v1240_v45 = vpop.f32.mrb[13].mxu0  ;;  %v1262_v47 = vpop.f32.mrb[13].mxu1 }
 0x227   :  { %v1241_v46 = vadd.f32 %v1240_v45, %v1239_v43  ;;  %v1242_v48 = vpop.f32.mrb[14].mxu0  ;;  %v1263_v49 = vadd.f32 %v1262_v47, %v1261_v44  ;;  %v1264_v50 = vpop.f32.mrb[14].mxu1 }
 0x228   :  { %v1243_v51 = vpop.f32.mrb[15].mxu0  ;;  %v1265_v53 = vpop.f32.mrb[15].mxu1 }
 0x229   :  { %v1031_v52 = vadd.f32 %v1241_v46, %v991_v42 }
 0x22b   :  { %v1071_v54 = vadd.f32 %v1263_v49, %v1031_v52 }
 0x22d   :  { %1076 = vst [vmem:[#allocation10] sm:$0xff] %v1071_v54 }
 0x22e   :  { %1440 = shalt.err (!%p1437_p8)
}
 0x22f   :  { %s1441_s21 = scalar_lea.hbm %s1594_s5, 128 }
 0x230   :  { %p1442_p9 = scmp.ne.s32.totalorder %s1594_s5, %s1441_s21  ;;  %p1445_p10 = scmp.lt.u32.totalorder %s1441_s21, %s1594_s5 }
 0x232   :  { %p1447_p11 = pnand %p1445_p10, %p1442_p9 }
 0x234   :  { %1450 = shalt.err (!%p1447_p11)
}
 0x235   :  { %1086 = dma.vmem_to_hbm [thread:$0]  %s1084_s1, 128, %s1594_s5, [#allocation4]  }
 0x236   :  { %1457 = dma.done.wait [#allocation4], 128  }
 0x237   :  { %1458 = vsyncadd [#allocation4], 4294967168 }
 0x238   :  { %1090 = vsyncpa [#allocation3], 1 }
 0x239   :  { %1091 = vsyncpa [#allocation6], 1 }
 0x23a   :  { %1092 = vsyncpa [#allocation9], 1 }
 0x23b   :  { %1093 = vsyncpa [#allocation4], 1 }

</bundles_post_ra>
